<compile_context>
chip_gen: v5e
topology: v5e:2x2
jax: 0.10.0
libtpu: 0.0.40
codegen_flags: <defaults>
</compile_context>

<pallas_src>
import functools

import jax
import jax.numpy as jnp
from jax.experimental import pallas as pl
from jax.experimental.pallas import tpu as pltpu


def _round_up(x, m):
    return ((x + m - 1) // m) * m


# ---------------------------------------------------------------------------
# Pallas kernels
# ---------------------------------------------------------------------------
def feature_transform_kernel(x_ref, w_ref, o_ref):
    """One row-block of XW = X @ W.  Operands are already in compute dtype."""
    o_ref[...] = jnp.dot(
        x_ref[...], w_ref[...], preferred_element_type=jnp.float32
    ).astype(o_ref.dtype)


def gcn_aggregate_kernel(*refs, tk, feat_resident, fused_weight,
                         apply_relu, fuse_log_softmax, valid_cols):
    """out[i-block] = (sum_k A[i,k] @ F[k]) (@ W2) + b  (+ ReLU / log_softmax).

    F is either a VMEM-resident full matrix (constant-index BlockSpec) sliced
    per k, or a per-k (tk, D) slab.  All epilogue math is f32.
    """
    if fused_weight:
        a_ref, f_ref, w_ref, b_ref, o_ref, acc_ref = refs
    else:
        a_ref, f_ref, b_ref, o_ref, acc_ref = refs
        w_ref = None

    k = pl.program_id(1)

    @pl.when(k == 0)
    def _():
        acc_ref[...] = jnp.zeros_like(acc_ref)

    if feat_resident:
        start = pl.multiple_of(k * tk, 128)
        feat = f_ref[pl.ds(start, tk), :]
    else:
        feat = f_ref[...]

    acc_ref[...] += jnp.dot(a_ref[...], feat, preferred_element_type=jnp.float32)

    @pl.when(k == pl.num_programs(1) - 1)
    def _():
        out = acc_ref[...]
        if fused_weight:
            # (A @ H) @ W2 in the epilogue; W2 is a tiny resident VMEM block.
            out = jnp.dot(out.astype(w_ref.dtype), w_ref[...],
                          preferred_element_type=jnp.float32)
        out = out + b_ref[...]                       # f32 epilogue
        if apply_relu:
            out = jnp.maximum(out, 0.0)
        if fuse_log_softmax:
            # Padded lanes (col >= valid_cols) must not contribute to softmax.
            col = jax.lax.broadcasted_iota(jnp.int32, out.shape, 1)
            valid = col < valid_cols
            masked = jnp.where(valid, out, -jnp.inf)
            m = jnp.max(masked, axis=1, keepdims=True)
            z = masked - m
            lse = jnp.log(jnp.sum(jnp.exp(z), axis=1, keepdims=True))
            out = jnp.where(valid, z - lse, 0.0)
        o_ref[...] = out.astype(o_ref.dtype)


# ---------------------------------------------------------------------------
# pallas_call wrappers
# ---------------------------------------------------------------------------
def feature_transform(x_p, w_p, *, tm, vmem_limit_bytes):
    n_pad, f_in_pad = x_p.shape
    f_out_pad = w_p.shape[1]
    return pl.pallas_call(
        feature_transform_kernel,
        out_shape=jax.ShapeDtypeStruct((n_pad, f_out_pad), x_p.dtype),
        grid_spec=pltpu.PrefetchScalarGridSpec(
            num_scalar_prefetch=0,
            grid=(n_pad // tm,),
            in_specs=[
                pl.BlockSpec((tm, f_in_pad), lambda i: (i, 0)),         # rows of X
                pl.BlockSpec((f_in_pad, f_out_pad), lambda i: (0, 0)),  # full W
            ],
            out_specs=pl.BlockSpec((tm, f_out_pad), lambda i: (i, 0)),
        ),
        compiler_params=pltpu.CompilerParams(
            dimension_semantics=("parallel",),
            vmem_limit_bytes=vmem_limit_bytes),
    )(x_p, w_p)


def gcn_aggregate(a_p, feat_p, b_p, w_p=None, *, apply_relu=False,
                  fuse_log_softmax=False, valid_cols=1, out_dtype,
                  tm, tk, vmem_limit_bytes):
    n_pad = a_p.shape[0]
    feat_dim = feat_p.shape[1]
    out_dim = w_p.shape[1] if w_p is not None else feat_dim

    # Keep XW / H fully VMEM-resident (DMA'd once) when it fits a 16 MiB
    # double-buffer budget; otherwise fall back to per-k slab tiling.
    feat_bytes = feat_p.size * feat_p.dtype.itemsize
    feat_resident = (2 * feat_bytes) <= (16 << 20)

    if feat_resident:
        feat_spec = pl.BlockSpec((n_pad, feat_dim), lambda i, k: (0, 0))
    else:
        feat_spec = pl.BlockSpec((tk, feat_dim), lambda i, k: (k, 0))

    in_specs = [pl.BlockSpec((tm, tk), lambda i, k: (i, k)), feat_spec]
    operands = [a_p, feat_p]
    if w_p is not None:
        in_specs.append(pl.BlockSpec(w_p.shape, lambda i, k: (0, 0)))   # resident W2
        operands.append(w_p)
    in_specs.append(pl.BlockSpec((1, out_dim), lambda i, k: (0, 0)))    # bias
    operands.append(b_p)

    kernel = functools.partial(
        gcn_aggregate_kernel, tk=tk, feat_resident=feat_resident,
        fused_weight=w_p is not None, apply_relu=apply_relu,
        fuse_log_softmax=fuse_log_softmax, valid_cols=valid_cols)

    return pl.pallas_call(
        kernel,
        out_shape=jax.ShapeDtypeStruct((n_pad, out_dim), out_dtype),
        grid_spec=pltpu.PrefetchScalarGridSpec(
            num_scalar_prefetch=0,
            grid=(n_pad // tm, n_pad // tk),
            in_specs=in_specs,
            out_specs=pl.BlockSpec((tm, out_dim), lambda i, k: (i, 0)),
            scratch_shapes=[pltpu.VMEM((tm, feat_dim), jnp.float32)],
        ),
        compiler_params=pltpu.CompilerParams(
            dimension_semantics=("parallel", "arbitrary"),
            vmem_limit_bytes=vmem_limit_bytes),
    )(*operands)


# ---------------------------------------------------------------------------
# Forward-pass factory: padding / casting hoisted out of the per-call path
# ---------------------------------------------------------------------------
def make_gcn_forward(params, a_hat, *, compute_dtype=jnp.bfloat16,
                     tm=256, tk=2048, vmem_limit_bytes=48 * 1024 * 1024):
    """Returns a jitted forward(x) closing over the padded/casted constants.

    Defaults tm=256 / tk=2048 target v6e/v7x (sweep 256-512 / 1024-2048);
    both are clamped to the padded node count for small graphs.
    """
    n = a_hat.shape[0]
    f_in, hid = params["w1"].shape
    f_out = params["w2"].shape[1]

    # --- tile derivation (tk snapped to a multiple of tm; no silent collapse) ---
    n128 = _round_up(n, 128)
    tm_eff = min(tm, n128)
    tk_eff = max(tm_eff, (min(tk, n128) // tm_eff) * tm_eff)
    n_pad = _round_up(n, tk_eff)
    # v7x has 2 TensorCores: prefer an even (>=2) row-block count on the
    # "parallel" axis so neither core idles on the dominant aggregation kernel.
    if (n_pad // tm_eff) % 2 == 1 and tm_eff >= 256:
        tm_eff //= 2

    f_in_pad = _round_up(f_in, 128)
    hid_pad = _round_up(hid, 128)
    f_out_pad = _round_up(f_out, 128)

    # --- one-time pad + cast (not repeated per forward call) ---
    a_p = jnp.pad(a_hat, ((0, n_pad - n), (0, n_pad - n))).astype(compute_dtype)
    w1_p = jnp.pad(params["w1"], ((0, f_in_pad - f_in), (0, hid_pad - hid))
                   ).astype(compute_dtype)
    b1_p = jnp.pad(params["b1"], (0, hid_pad - hid)
                   ).reshape(1, hid_pad).astype(jnp.float32)
    w2_p = jnp.pad(params["w2"], ((0, hid_pad - hid), (0, f_out_pad - f_out))
                   ).astype(compute_dtype)
    b2_p = jnp.pad(params["b2"], (0, f_out_pad - f_out)
                   ).reshape(1, f_out_pad).astype(jnp.float32)

    # Fusing W2 into the aggregation epilogue costs no extra padded FLOPs when
    # hid_pad <= f_out_pad (true here: both 128); otherwise keep A @ (H @ W2).
    fuse_w2 = hid_pad <= f_out_pad

    @jax.jit
    def forward(x):
        x_p = jnp.pad(x, ((0, n_pad - n), (0, f_in_pad - f_in))).astype(compute_dtype)

        # Layer 1: XW1 once, then K-tiled aggregation with fused bias + ReLU.
        xw1 = feature_transform(x_p, w1_p, tm=tm_eff,
                                vmem_limit_bytes=vmem_limit_bytes)
        h = gcn_aggregate(a_p, xw1, b1_p, apply_relu=True,
                          out_dtype=compute_dtype, tm=tm_eff, tk=tk_eff,
                          vmem_limit_bytes=vmem_limit_bytes)

        # Layer 2: aggregation with W2 + bias + log_softmax fused in the epilogue.
        if fuse_w2:
            out_p = gcn_aggregate(a_p, h, b2_p, w_p=w2_p,
                                  fuse_log_softmax=True, valid_cols=f_out,
                                  out_dtype=jnp.float32, tm=tm_eff, tk=tk_eff,
                                  vmem_limit_bytes=vmem_limit_bytes)
        else:
            xw2 = feature_transform(h, w2_p, tm=tm_eff,
                                    vmem_limit_bytes=vmem_limit_bytes)
            out_p = gcn_aggregate(a_p, xw2, b2_p,
                                  fuse_log_softmax=True, valid_cols=f_out,
                                  out_dtype=jnp.float32, tm=tm_eff, tk=tk_eff,
                                  vmem_limit_bytes=vmem_limit_bytes)

        return out_p[:n, :f_out]

    return forward


# ---------------------------------------------------------------------------
# References and graph utilities
# ---------------------------------------------------------------------------
def gcn_forward_matched_ref(params, x, a_hat, *, compute_dtype=jnp.bfloat16,
                            reassociate_layer2=True):
    """Plain-JAX reference mirroring the kernel's exact operand-cast points
    (including the layer-2 reassociation (A@H)@W2 when fused)."""
    cd = compute_dtype

    def mm(a, b):
        return jnp.dot(a.astype(cd), b.astype(cd), preferred_element_type=jnp.float32)

    xw1 = mm(x, params["w1"]).astype(cd)
    h = jax.nn.relu(mm(a_hat, xw1) + params["b1"]).astype(cd)
    if reassociate_layer2:
        ah = mm(a_hat, h).astype(cd)
        logits = mm(ah, params["w2"]) + params["b2"]
    else:
        xw2 = mm(h, params["w2"]).astype(cd)
        logits = mm(a_hat, xw2) + params["b2"]
    return jax.nn.log_softmax(logits, axis=1)


def gcn_forward_f32_ref(params, x, a_hat):
    """Pure-f32 reference in the original PyTorch op order."""
    h = jax.nn.relu(a_hat @ (x @ params["w1"]) + params["b1"])
    logits = a_hat @ (h @ params["w2"]) + params["b2"]
    return jax.nn.log_softmax(logits, axis=1)


def build_norm_adj(edge_index, num_nodes):
    """Dense D^-1/2 (A + I) D^-1/2 with A[dst, src] accumulating edge multiplicity."""
    src, dst = edge_index[0], edge_index[1]
    a = jnp.zeros((num_nodes, num_nodes), jnp.float32)
    a = a.at[dst, src].add(1.0)                     # count duplicates like PyG scatter-add
    a = a + jnp.eye(num_nodes, dtype=jnp.float32)   # self loops
    deg = jnp.sum(a, axis=1)
    d_inv_sqrt = jnp.where(deg > 0, 1.0 / jnp.sqrt(deg), 0.0)
    return d_inv_sqrt[:, None] * a * d_inv_sqrt[None, :]


def glorot(key, shape):
    fan_in, fan_out = shape
    limit = jnp.sqrt(6.0 / (fan_in + fan_out))
    return jax.random.uniform(key, shape, jnp.float32, -limit, limit)


if __name__ == "__main__":
    N, IN_DIM, HID_DIM, OUT_DIM = 16, 8, 32, 4

    key = jax.random.PRNGKey(0)
    kx, ke, kw1, kb1, kw2, kb2 = jax.random.split(key, 6)

    # Node features
    x = jax.random.normal(kx, (N, IN_DIM), jnp.float32)

    # Deterministic small graph: undirected ring + a few chords (no self loops)
    ring_src = jnp.arange(N, dtype=jnp.int32)
    ring_dst = (ring_src + 1) % N
    chord_src = jax.random.randint(ke, (8,), 0, N, dtype=jnp.int32)
    chord_dst = (chord_src + 3) % N
    edge_index = jnp.stack(
        [jnp.concatenate([ring_src, ring_dst, chord_src]),
         jnp.concatenate([ring_dst, ring_src, chord_dst])]
    )  # shape [2, E]

    # Deterministic parameters (GCNConv: linear weight + bias per layer)
    params = {
        "w1": glorot(kw1, (IN_DIM, HID_DIM)),
        "b1": 0.1 * jax.random.normal(kb1, (HID_DIM,), jnp.float32),
        "w2": glorot(kw2, (HID_DIM, OUT_DIM)),
        "b2": 0.1 * jax.random.normal(kb2, (OUT_DIM,), jnp.float32),
    }

    a_hat = build_norm_adj(edge_index, N)

    # Padding / casting of constants happens once here, not per forward call.
    forward = make_gcn_forward(params, a_hat, compute_dtype=jnp.bfloat16)
    out = jax.block_until_ready(forward(x))
    assert out.shape == (N, OUT_DIM)

    # Tight check against a reference with identical bf16 operand-cast points
    # (the kernel fuses W2 into the epilogue since hid_pad == f_out_pad here).
    fused = _round_up(HID_DIM, 128) <= _round_up(OUT_DIM, 128)
    ref_bf16 = gcn_forward_matched_ref(params, x, a_hat,
                                       compute_dtype=jnp.bfloat16,
                                       reassociate_layer2=fused)
    assert jnp.allclose(out, ref_bf16, atol=2e-3, rtol=2e-3), "mismatch vs bf16 reference"

    # Loose semantic check against the pure-f32 PyTorch-order reference.
    ref_f32 = gcn_forward_f32_ref(params, x, a_hat)
    assert jnp.allclose(out, ref_f32, atol=1e-1, rtol=1e-1), "mismatch vs f32 reference"

    # Rows are valid log-probability distributions (log_softmax done in f32).
    assert jnp.allclose(jnp.sum(jnp.exp(out), axis=1), 1.0, atol=1e-3)

    print("KERNEL_OK")
</pallas_src>

<mosaic_0001>
module attributes {stable_mosaic.version = 11 : i64} {
  func.func @feature_transform_kernel(%arg0: i32, %arg1: memref<128x128xbf16, #tpu.memory_space<vmem>>, %arg2: memref<128x128xbf16, #tpu.memory_space<vmem>>, %arg3: memref<128x128xbf16, #tpu.memory_space<vmem>>) attributes {dimension_semantics = [#tpu.dimension_semantics<parallel>], iteration_bounds = array<i64: 1>, scalar_prefetch = 0 : i64, scratch_operands = 0 : i64, tpu.core_type = #tpu.core_type<tc>, window_params = [{transform_indices = @transform_0, window_bounds = array<i64: 128, 128>}, {pipeline_mode = #tpu.pipeline_mode<synchronous>, transform_indices = @transform_1, window_bounds = array<i64: 128, 128>}, {transform_indices = @transform_2, window_bounds = array<i64: 128, 128>}]} {
    %c0 = arith.constant 0 : index
    %c0_0 = arith.constant 0 : index
    %0 = vector.load %arg1[%c0, %c0_0] : memref<128x128xbf16, #tpu.memory_space<vmem>>, vector<128x128xbf16>
    %c0_1 = arith.constant 0 : index
    %c0_2 = arith.constant 0 : index
    %1 = vector.load %arg2[%c0_1, %c0_2] : memref<128x128xbf16, #tpu.memory_space<vmem>>, vector<128x128xbf16>
    %cst = arith.constant dense<0.000000e+00> : vector<128x128xf32>
    %2 = tpu.matmul %0, %1, %cst {dimension_numbers = #tpu.dot_dimension_numbers<[1], [0], [0], [1], [0, 0, 1, 1], [], []>} : vector<128x128xbf16>, vector<128x128xbf16>, vector<128x128xf32> -> vector<128x128xf32>
    %3 = arith.truncf %2 : vector<128x128xf32> to vector<128x128xbf16>
    %c0_3 = arith.constant 0 : index
    %c0_4 = arith.constant 0 : index
    %4 = vector.load %arg3[%c0_3, %c0_4] : memref<128x128xbf16, #tpu.memory_space<vmem>>, vector<128x128xbf16>
    tpu.vector_store %arg3[%c0_3, %c0_4], %3 {strides = array<i32>} : memref<128x128xbf16, #tpu.memory_space<vmem>>, vector<128x128xbf16>,
    return
  }
  func.func @transform_0(%arg0: i32) -> (i32, i32) {
    %c0_i32 = arith.constant 0 : i32
    %c0_i32_0 = arith.constant 0 : i32
    return %arg0, %c0_i32 : i32, i32
  }
  func.func @transform_1(%arg0: i32) -> (i32, i32) {
    %c0_i32 = arith.constant 0 : i32
    %c0_i32_0 = arith.constant 0 : i32
    %c0_i32_1 = arith.constant 0 : i32
    return %c0_i32, %c0_i32_0 : i32, i32
  }
  func.func @transform_2(%arg0: i32) -> (i32, i32) {
    %c0_i32 = arith.constant 0 : i32
    %c0_i32_0 = arith.constant 0 : i32
    return %arg0, %c0_i32 : i32, i32
  }
}

module attributes {stable_mosaic.version = 11 : i64} {
  func.func @gcn_aggregate_kernel(%arg0: i32, %arg1: i32, %arg2: memref<128x128xbf16, #tpu.memory_space<vmem>>, %arg3: memref<128x128xbf16, #tpu.memory_space<vmem>>, %arg4: memref<1x128xf32, #tpu.memory_space<vmem>>, %arg5: memref<128x128xbf16, #tpu.memory_space<vmem>>, %arg6: memref<128x128xf32, #tpu.memory_space<vmem>>) attributes {dimension_semantics = [#tpu.dimension_semantics<parallel>, #tpu.dimension_semantics<arbitrary>], iteration_bounds = array<i64: 1, 1>, scalar_prefetch = 0 : i64, scratch_operands = 1 : i64, tpu.core_type = #tpu.core_type<tc>, window_params = [{transform_indices = @transform_0, window_bounds = array<i64: 128, 128>}, {pipeline_mode = #tpu.pipeline_mode<synchronous>, transform_indices = @transform_1, window_bounds = array<i64: 128, 128>}, {pipeline_mode = #tpu.pipeline_mode<synchronous>, transform_indices = @transform_2, window_bounds = array<i64: 1, 128>}, {transform_indices = @transform_3, window_bounds = array<i64: 128, 128>}]} {
    %c0_i32 = arith.constant 0 : i32
    %0 = arith.cmpi eq, %arg1, %c0_i32 : i32
    %1 = arith.extui %0 : i1 to i32
    %c0_i32_0 = arith.constant 0 : i32
    %2 = arith.cmpi ne, %1, %c0_i32_0 : i32
    scf.if %2 {
      %cst_9 = arith.constant 0.000000e+00 : f32
      %15 = vector.broadcast %cst_9 : f32 to vector<128x128xf32>
      %c0_10 = arith.constant 0 : index
      %c0_11 = arith.constant 0 : index
      %16 = vector.load %arg6[%c0_10, %c0_11] : memref<128x128xf32, #tpu.memory_space<vmem>>, vector<128x128xf32>
      tpu.vector_store %arg6[%c0_10, %c0_11], %15 {strides = array<i32>} : memref<128x128xf32, #tpu.memory_space<vmem>>, vector<128x128xf32>,
    } else {
    }
    %c128_i32 = arith.constant 128 : i32
    %3 = arith.muli %arg1, %c128_i32 : i32
    %4 = tpu.assume_multiple %3, 128 : i32
    %5 = arith.index_cast %4 : i32 to index
    %c0 = arith.constant 0 : index
    %6 = vector.load %arg3[%5, %c0] : memref<128x128xbf16, #tpu.memory_space<vmem>>, vector<128x128xbf16>
    %c0_1 = arith.constant 0 : index
    %c0_2 = arith.constant 0 : index
    %7 = vector.load %arg6[%c0_1, %c0_2] : memref<128x128xf32, #tpu.memory_space<vmem>>, vector<128x128xf32>
    %c0_3 = arith.constant 0 : index
    %c0_4 = arith.constant 0 : index
    %8 = vector.load %arg2[%c0_3, %c0_4] : memref<128x128xbf16, #tpu.memory_space<vmem>>, vector<128x128xbf16>
    %cst = arith.constant dense<0.000000e+00> : vector<128x128xf32>
    %9 = tpu.matmul %8, %6, %cst {dimension_numbers = #tpu.dot_dimension_numbers<[1], [0], [0], [1], [0, 0, 1, 1], [], []>} : vector<128x128xbf16>, vector<128x128xbf16>, vector<128x128xf32> -> vector<128x128xf32>
    %10 = arith.addf %7, %9 : vector<128x128xf32>
    %c0_5 = arith.constant 0 : index
    %c0_6 = arith.constant 0 : index
    %11 = vector.load %arg6[%c0_5, %c0_6] : memref<128x128xf32, #tpu.memory_space<vmem>>, vector<128x128xf32>
    tpu.vector_store %arg6[%c0_5, %c0_6], %10 {strides = array<i32>} : memref<128x128xf32, #tpu.memory_space<vmem>>, vector<128x128xf32>,
    %c0_i32_7 = arith.constant 0 : i32
    %12 = arith.cmpi eq, %arg1, %c0_i32_7 : i32
    %13 = arith.extui %12 : i1 to i32
    %c0_i32_8 = arith.constant 0 : i32
    %14 = arith.cmpi ne, %13, %c0_i32_8 : i32
    scf.if %14 {
      %c0_9 = arith.constant 0 : index
      %c0_10 = arith.constant 0 : index
      %15 = vector.load %arg6[%c0_9, %c0_10] : memref<128x128xf32, #tpu.memory_space<vmem>>, vector<128x128xf32>
      %c0_11 = arith.constant 0 : index
      %c0_12 = arith.constant 0 : index
      %16 = vector.load %arg4[%c0_11, %c0_12] : memref<1x128xf32, #tpu.memory_space<vmem>>, vector<1x128xf32>
      %17 = vector.broadcast %16 : vector<1x128xf32> to vector<128x128xf32>
      %18 = arith.addf %15, %17 : vector<128x128xf32>
      %cst_13 = arith.constant 0.000000e+00 : f32
      %19 = vector.broadcast %cst_13 : f32 to vector<128x128xf32>
      %20 = arith.maximumf %18, %19 : vector<128x128xf32>
      %21 = arith.truncf %20 : vector<128x128xf32> to vector<128x128xbf16>
      %c0_14 = arith.constant 0 : index
      %c0_15 = arith.constant 0 : index
      %22 = vector.load %arg5[%c0_14, %c0_15] : memref<128x128xbf16, #tpu.memory_space<vmem>>, vector<128x128xbf16>
      tpu.vector_store %arg5[%c0_14, %c0_15], %21 {strides = array<i32>} : memref<128x128xbf16, #tpu.memory_space<vmem>>, vector<128x128xbf16>,
    } else {
    }
    return
  }
  func.func @transform_0(%arg0: i32, %arg1: i32) -> (i32, i32) {
    %c0_i32 = arith.constant 0 : i32
    return %arg0, %arg1 : i32, i32
  }
  func.func @transform_1(%arg0: i32, %arg1: i32) -> (i32, i32) {
    %c0_i32 = arith.constant 0 : i32
    %c0_i32_0 = arith.constant 0 : i32
    %c0_i32_1 = arith.constant 0 : i32
    return %c0_i32, %c0_i32_0 : i32, i32
  }
  func.func @transform_2(%arg0: i32, %arg1: i32) -> (i32, i32) {
    %c0_i32 = arith.constant 0 : i32
    %c0_i32_0 = arith.constant 0 : i32
    %c0_i32_1 = arith.constant 0 : i32
    return %c0_i32, %c0_i32_0 : i32, i32
  }
  func.func @transform_3(%arg0: i32, %arg1: i32) -> (i32, i32) {
    %c0_i32 = arith.constant 0 : i32
    %c0_i32_0 = arith.constant 0 : i32
    return %arg0, %c0_i32 : i32, i32
  }
}

module attributes {stable_mosaic.version = 11 : i64} {
  func.func @gcn_aggregate_kernel(%arg0: i32, %arg1: i32, %arg2: memref<128x128xbf16, #tpu.memory_space<vmem>>, %arg3: memref<128x128xbf16, #tpu.memory_space<vmem>>, %arg4: memref<128x128xbf16, #tpu.memory_space<vmem>>, %arg5: memref<1x128xf32, #tpu.memory_space<vmem>>, %arg6: memref<128x128xf32, #tpu.memory_space<vmem>>, %arg7: memref<128x128xf32, #tpu.memory_space<vmem>>) attributes {dimension_semantics = [#tpu.dimension_semantics<parallel>, #tpu.dimension_semantics<arbitrary>], iteration_bounds = array<i64: 1, 1>, scalar_prefetch = 0 : i64, scratch_operands = 1 : i64, tpu.core_type = #tpu.core_type<tc>, window_params = [{transform_indices = @transform_0, window_bounds = array<i64: 128, 128>}, {pipeline_mode = #tpu.pipeline_mode<synchronous>, transform_indices = @transform_1, window_bounds = array<i64: 128, 128>}, {pipeline_mode = #tpu.pipeline_mode<synchronous>, transform_indices = @transform_2, window_bounds = array<i64: 128, 128>}, {pipeline_mode = #tpu.pipeline_mode<synchronous>, transform_indices = @transform_3, window_bounds = array<i64: 1, 128>}, {transform_indices = @transform_4, window_bounds = array<i64: 128, 128>}]} {
    %c0_i32 = arith.constant 0 : i32
    %0 = arith.cmpi eq, %arg1, %c0_i32 : i32
    %1 = arith.extui %0 : i1 to i32
    %c0_i32_0 = arith.constant 0 : i32
    %2 = arith.cmpi ne, %1, %c0_i32_0 : i32
    scf.if %2 {
      %cst_9 = arith.constant 0.000000e+00 : f32
      %15 = vector.broadcast %cst_9 : f32 to vector<128x128xf32>
      %c0_10 = arith.constant 0 : index
      %c0_11 = arith.constant 0 : index
      %16 = vector.load %arg7[%c0_10, %c0_11] : memref<128x128xf32, #tpu.memory_space<vmem>>, vector<128x128xf32>
      tpu.vector_store %arg7[%c0_10, %c0_11], %15 {strides = array<i32>} : memref<128x128xf32, #tpu.memory_space<vmem>>, vector<128x128xf32>,
    } else {
    }
    %c128_i32 = arith.constant 128 : i32
    %3 = arith.muli %arg1, %c128_i32 : i32
    %4 = tpu.assume_multiple %3, 128 : i32
    %5 = arith.index_cast %4 : i32 to index
    %c0 = arith.constant 0 : index
    %6 = vector.load %arg3[%5, %c0] : memref<128x128xbf16, #tpu.memory_space<vmem>>, vector<128x128xbf16>
    %c0_1 = arith.constant 0 : index
    %c0_2 = arith.constant 0 : index
    %7 = vector.load %arg7[%c0_1, %c0_2] : memref<128x128xf32, #tpu.memory_space<vmem>>, vector<128x128xf32>
    %c0_3 = arith.constant 0 : index
    %c0_4 = arith.constant 0 : index
    %8 = vector.load %arg2[%c0_3, %c0_4] : memref<128x128xbf16, #tpu.memory_space<vmem>>, vector<128x128xbf16>
    %cst = arith.constant dense<0.000000e+00> : vector<128x128xf32>
    %9 = tpu.matmul %8, %6, %cst {dimension_numbers = #tpu.dot_dimension_numbers<[1], [0], [0], [1], [0, 0, 1, 1], [], []>} : vector<128x128xbf16>, vector<128x128xbf16>, vector<128x128xf32> -> vector<128x128xf32>
    %10 = arith.addf %7, %9 : vector<128x128xf32>
    %c0_5 = arith.constant 0 : index
    %c0_6 = arith.constant 0 : index
    %11 = vector.load %arg7[%c0_5, %c0_6] : memref<128x128xf32, #tpu.memory_space<vmem>>, vector<128x128xf32>
    tpu.vector_store %arg7[%c0_5, %c0_6], %10 {strides = array<i32>} : memref<128x128xf32, #tpu.memory_space<vmem>>, vector<128x128xf32>,
    %c0_i32_7 = arith.constant 0 : i32
    %12 = arith.cmpi eq, %arg1, %c0_i32_7 : i32
    %13 = arith.extui %12 : i1 to i32
    %c0_i32_8 = arith.constant 0 : i32
    %14 = arith.cmpi ne, %13, %c0_i32_8 : i32
    scf.if %14 {
      %c0_9 = arith.constant 0 : index
      %c0_10 = arith.constant 0 : index
      %15 = vector.load %arg7[%c0_9, %c0_10] : memref<128x128xf32, #tpu.memory_space<vmem>>, vector<128x128xf32>
      %16 = arith.truncf %15 : vector<128x128xf32> to vector<128x128xbf16>
      %c0_11 = arith.constant 0 : index
      %c0_12 = arith.constant 0 : index
      %17 = vector.load %arg4[%c0_11, %c0_12] : memref<128x128xbf16, #tpu.memory_space<vmem>>, vector<128x128xbf16>
      %cst_13 = arith.constant dense<0.000000e+00> : vector<128x128xf32>
      %18 = tpu.matmul %16, %17, %cst_13 {dimension_numbers = #tpu.dot_dimension_numbers<[1], [0], [0], [1], [0, 0, 1, 1], [], []>} : vector<128x128xbf16>, vector<128x128xbf16>, vector<128x128xf32> -> vector<128x128xf32>
      %c0_14 = arith.constant 0 : index
      %c0_15 = arith.constant 0 : index
      %19 = vector.load %arg5[%c0_14, %c0_15] : memref<1x128xf32, #tpu.memory_space<vmem>>, vector<1x128xf32>
      %20 = vector.broadcast %19 : vector<1x128xf32> to vector<128x128xf32>
      %21 = arith.addf %18, %20 : vector<128x128xf32>
      %22 = tpu.iota {dimensions = array<i32: 1>} : vector<128x128xi32>
      %c4_i32 = arith.constant 4 : i32
      %23 = vector.broadcast %c4_i32 : i32 to vector<128x128xi32>
      %24 = arith.cmpi slt, %22, %23 : vector<128x128xi32>
      %cst_16 = arith.constant 0xFF800000 : f32
      %25 = vector.broadcast %cst_16 : f32 to vector<128x128xf32>
      %26 = arith.select %24, %21, %25 : vector<128x128xi1>, vector<128x128xf32>
      %cst_17 = arith.constant dense<0xFF800000> : vector<128xf32>
      %27 = vector.multi_reduction <maximumf>, %26, %cst_17 [1] : vector<128x128xf32> to vector<128xf32>
      %28 = vector.shape_cast %27 : vector<128xf32> to vector<128x1xf32>
      %29 = vector.broadcast %28 : vector<128x1xf32> to vector<128x128xf32>
      %30 = arith.subf %26, %29 : vector<128x128xf32>
      %31 = math.exp %30 : vector<128x128xf32>
      %cst_18 = arith.constant dense<0.000000e+00> : vector<128xf32>
      %32 = vector.multi_reduction <add>, %31, %cst_18 [1] : vector<128x128xf32> to vector<128xf32>
      %33 = vector.shape_cast %32 : vector<128xf32> to vector<128x1xf32>
      %34 = math.log %33 : vector<128x1xf32>
      %35 = vector.broadcast %34 : vector<128x1xf32> to vector<128x128xf32>
      %36 = arith.subf %30, %35 : vector<128x128xf32>
      %cst_19 = arith.constant 0.000000e+00 : f32
      %37 = vector.broadcast %cst_19 : f32 to vector<128x128xf32>
      %38 = arith.select %24, %36, %37 : vector<128x128xi1>, vector<128x128xf32>
      %c0_20 = arith.constant 0 : index
      %c0_21 = arith.constant 0 : index
      %39 = vector.load %arg6[%c0_20, %c0_21] : memref<128x128xf32, #tpu.memory_space<vmem>>, vector<128x128xf32>
      tpu.vector_store %arg6[%c0_20, %c0_21], %38 {strides = array<i32>} : memref<128x128xf32, #tpu.memory_space<vmem>>, vector<128x128xf32>,
    } else {
    }
    return
  }
  func.func @transform_0(%arg0: i32, %arg1: i32) -> (i32, i32) {
    %c0_i32 = arith.constant 0 : i32
    return %arg0, %arg1 : i32, i32
  }
  func.func @transform_1(%arg0: i32, %arg1: i32) -> (i32, i32) {
    %c0_i32 = arith.constant 0 : i32
    %c0_i32_0 = arith.constant 0 : i32
    %c0_i32_1 = arith.constant 0 : i32
    return %c0_i32, %c0_i32_0 : i32, i32
  }
  func.func @transform_2(%arg0: i32, %arg1: i32) -> (i32, i32) {
    %c0_i32 = arith.constant 0 : i32
    %c0_i32_0 = arith.constant 0 : i32
    %c0_i32_1 = arith.constant 0 : i32
    return %c0_i32, %c0_i32_0 : i32, i32
  }
  func.func @transform_3(%arg0: i32, %arg1: i32) -> (i32, i32) {
    %c0_i32 = arith.constant 0 : i32
    %c0_i32_0 = arith.constant 0 : i32
    %c0_i32_1 = arith.constant 0 : i32
    return %c0_i32, %c0_i32_0 : i32, i32
  }
  func.func @transform_4(%arg0: i32, %arg1: i32) -> (i32, i32) {
    %c0_i32 = arith.constant 0 : i32
    %c0_i32_0 = arith.constant 0 : i32
    return %arg0, %c0_i32 : i32, i32
  }
}

</mosaic_0001>

<bundles_post_ra>
// kernel: forward.3
= control target key start
LH: loop header
LB: loop body
LE: loop exit
PB: predicated region body
PF: predicated region fallthrough
CT: control target
= control target key end

     0   :  { %7 = vsyncpa [#allocation3], 0  ;;  %s421_s12 = smov [#allocation2]   ;;  %s422_s14 = smov 64   ;;  %s490_s0 = inlined_call_operand.vmem [shape: bf16[128,128], index: 0, kind: input, shape index: {}]   ;;  %s491_s1 = inlined_call_operand.hbm [shape: bf16[128,128], index: 1, kind: input, shape index: {}]   ;;  %s492_s2 = inlined_call_operand.vmem [shape: bf16[128,128], index: 2, kind: output, shape index: {}]  }
   0x1   :  { %s14_s11 = sshll.u32 %s491_s1, 4  ;;  %s16_s13 = sshll.u32 %s421_s12, 4  ;;  %s15_s11 = int_to_ptr.hbm [resolvable:$true] %s14_s11  ;;  %s17_s13 = int_to_ptr.vmem [resolvable:$true] %s16_s13 }
   0x2   :  { %s423_s15 = smov 4  }
   0x3   :  { %22 = dma.hbm_to_vmem [thread:$0]  %s15_s11, 1024, %s17_s13, [#allocation3], %s422_s14, %s422_s14, %s423_s15  }
   0x4   :  { %419 = dma.done.wait [#allocation3], 1024  }
   0x5   :  { %420 = vsyncadd [#allocation3], 4294966272  ;;  %v320_v0 = vld [vmem:[#allocation2 + $0x38] sm:$0xff]  ;;  %v319_v1 = vld [vmem:[#allocation2 + $0x30] sm:$0xff] }
   0x6   :  { %155 = vmatpush.bf16.msra.mxu0 %v320_v0  ;;  %368 = vmatpush.bf16.msra.mxu1 %v320_v0  ;;  %v318_v2 = vld [vmem:[#allocation2 + $0x28] sm:$0xff]  ;;  %v317_v3 = vld [vmem:[#allocation2 + $0x20] sm:$0xff]  ;;  %v316_v4 = vld [vmem:[#allocation2 + $0x18] sm:$0xff] }
   0x7   :  { %369 = vmatpush.bf16.msra.mxu2 %v320_v0  ;;  %370 = vmatpush.bf16.msra.mxu3 %v320_v0  ;;  %v315_v5 = vld [vmem:[#allocation2 + $0x10] sm:$0xff]  ;;  %v314_v6 = vld [vmem:[#allocation2 + $0x8] sm:$0xff]  ;;  %v313_v7 = vld [vmem:[#allocation2] sm:$0xff] }
   0x8   :  { %v305_v8 = vld [vmem:[%s490_s0] sm:$0xff]  ;;  %v307_v9 = vld [vmem:[%s490_s0 + $0x10] sm:$0xff]  ;;  %v306_v12 = vld [vmem:[%s490_s0 + $0x8] sm:$0xff] }
   0x9   :  { %v309_v10 = vld [vmem:[%s490_s0 + $0x20] sm:$0xff]  ;;  %v311_v11 = vld [vmem:[%s490_s0 + $0x30] sm:$0xff]  ;;  %v308_v13 = vld [vmem:[%s490_s0 + $0x18] sm:$0xff] }
   0xa   :  { %156 = vmatpush.bf16.msra.mxu0 %v319_v1  ;;  %371 = vmatpush.bf16.msra.mxu1 %v319_v1  ;;  %v310_v14 = vld [vmem:[%s490_s0 + $0x28] sm:$0xff]  ;;  %v312_v15 = vld [vmem:[%s490_s0 + $0x38] sm:$0xff] }
   0xb   :  { %372 = vmatpush.bf16.msra.mxu2 %v319_v1  ;;  %373 = vmatpush.bf16.msra.mxu3 %v319_v1 }
   0xe   :  { %157 = vmatpush.bf16.msra.mxu0 %v318_v2  ;;  %374 = vmatpush.bf16.msra.mxu1 %v318_v2 }
   0xf   :  { %375 = vmatpush.bf16.msra.mxu2 %v318_v2  ;;  %376 = vmatpush.bf16.msra.mxu3 %v318_v2 }
  0x12   :  { %158 = vmatpush.bf16.msra.mxu0 %v317_v3  ;;  %377 = vmatpush.bf16.msra.mxu1 %v317_v3 }
  0x13   :  { %378 = vmatpush.bf16.msra.mxu2 %v317_v3  ;;  %379 = vmatpush.bf16.msra.mxu3 %v317_v3 }
  0x16   :  { %159 = vmatpush.bf16.msra.mxu0 %v316_v4  ;;  %380 = vmatpush.bf16.msra.mxu1 %v316_v4 }
  0x17   :  { %381 = vmatpush.bf16.msra.mxu2 %v316_v4  ;;  %382 = vmatpush.bf16.msra.mxu3 %v316_v4 }
  0x1a   :  { %160 = vmatpush.bf16.msra.mxu0 %v315_v5  ;;  %383 = vmatpush.bf16.msra.mxu1 %v315_v5 }
  0x1b   :  { %384 = vmatpush.bf16.msra.mxu2 %v315_v5  ;;  %385 = vmatpush.bf16.msra.mxu3 %v315_v5 }
  0x1e   :  { %161 = vmatpush.bf16.msra.mxu0 %v314_v6  ;;  %386 = vmatpush.bf16.msra.mxu1 %v314_v6 }
  0x1f   :  { %387 = vmatpush.bf16.msra.mxu2 %v314_v6  ;;  %388 = vmatpush.bf16.msra.mxu3 %v314_v6 }
  0x22   :  { %162 = vmatpush.bf16.msra.mxu0 %v313_v7  ;;  %389 = vmatpush.bf16.msra.mxu1 %v313_v7 }
  0x23   :  { %390 = vmatpush.bf16.msra.mxu2 %v313_v7  ;;  %391 = vmatpush.bf16.msra.mxu3 %v313_v7 }
  0x25   :  { %163 = vmatmul.bf16.vlgmr.msra.gmra.mxu0 %v305_v8  ;;  %173 = vmatmul.bf16.vlgmr.msra.gmra.mxu1 %v307_v9 }
  0x26   :  { %183 = vmatmul.bf16.vlgmr.msra.gmra.mxu2 %v309_v10  ;;  %193 = vmatmul.bf16.vlgmr.msra.gmra.mxu3 %v311_v11 }
  0x35   :  { %168 = vmatmul.bf16.gmra.mxu0 %v306_v12  ;;  %178 = vmatmul.bf16.gmra.mxu1 %v308_v13 }
  0x36   :  { %188 = vmatmul.bf16.gmra.mxu2 %v310_v14  ;;  %198 = vmatmul.bf16.gmra.mxu3 %v312_v15 }
  0xa2   :  { %v164_v16 = vpop.f32.mrf.mxu0  ;;  %v174_v17 = vpop.f32.mrf.mxu1 }
  0xa9   :  { %v184_v18 = vpop.f32.mrf.mxu2  ;;  %v194_v19 = vpop.f32.mrf.mxu3 }
  0xaa   :  { %v166_v20 = vpop.f32.mrf.mxu0  ;;  %v176_v21 = vpop.f32.mrf.mxu1 }
  0xab   :  { %v324_v22 = vpack.c.bf16 %v166_v20, %v164_v16  ;;  %v334_v23 = vpack.c.bf16 %v176_v21, %v174_v17 }
  0xad   :  { %325 = vst [vmem:[%s492_s2] sm:$0xff] %v324_v22  }
  0xae   :  { %362 = vst [vmem:[%s492_s2 + $0x10] sm:$0xff] %v334_v23  }
  0xb1   :  { %v186_v24 = vpop.f32.mrf.mxu2  ;;  %v196_v25 = vpop.f32.mrf.mxu3 }
  0xb2   :  { %v344_v26 = vpack.c.bf16 %v186_v24, %v184_v18  ;;  %v354_v27 = vpack.c.bf16 %v196_v25, %v194_v19  ;;  %v169_v28 = vpop.f32.mrf.mxu0  ;;  %v179_v29 = vpop.f32.mrf.mxu1 }
  0xb4   :  { %364 = vst [vmem:[%s492_s2 + $0x20] sm:$0xff] %v344_v26  }
  0xb5   :  { %366 = vst [vmem:[%s492_s2 + $0x30] sm:$0xff] %v354_v27  }
  0xb9   :  { %v189_v30 = vpop.f32.mrf.mxu2  ;;  %v199_v31 = vpop.f32.mrf.mxu3 }
  0xba   :  { %v171_v32 = vpop.f32.mrf.mxu0  ;;  %v181_v33 = vpop.f32.mrf.mxu1 }
  0xbb   :  { %v329_v34 = vpack.c.bf16 %v171_v32, %v169_v28  ;;  %v339_v35 = vpack.c.bf16 %v181_v33, %v179_v29 }
  0xbd   :  { %361 = vst [vmem:[%s492_s2 + $0x8] sm:$0xff] %v329_v34  }
  0xbe   :  { %363 = vst [vmem:[%s492_s2 + $0x18] sm:$0xff] %v339_v35  }
  0xc1   :  { %v191_v36 = vpop.f32.mrf.mxu2  ;;  %v201_v37 = vpop.f32.mrf.mxu3 }
  0xc2   :  { %v349_v38 = vpack.c.bf16 %v191_v36, %v189_v30  ;;  %v359_v39 = vpack.c.bf16 %v201_v37, %v199_v31 }
  0xc4   :  { %365 = vst [vmem:[%s492_s2 + $0x28] sm:$0xff] %v349_v38  }
  0xc5   :  { %367 = vst [vmem:[%s492_s2 + $0x38] sm:$0xff] %v359_v39  }
  0xc6   :  { %240 = vsyncpa [#allocation3], 1 }

// kernel: forward.4
= control target key start
LH: loop header
LB: loop body
LE: loop exit
PB: predicated region body
PF: predicated region fallthrough
CT: control target
= control target key end

     0   :  { %s604_s1 = inlined_call_operand.vmem [shape: bf16[128,128], index: 1, kind: input, shape index: {}]   ;;  %s605_s2 = inlined_call_operand.vmem [shape: f32[1,128], index: 2, kind: input, shape index: {}]   ;;  %s606_s0 = inlined_call_operand.vmem [shape: bf16[128,128], index: 0, kind: input, shape index: {}]   ;;  %s607_s3 = inlined_call_operand.vmem [shape: bf16[128,128], index: 3, kind: output, shape index: {}]  }
   0x1   :  { %v428_v0 = vld [vmem:[%s604_s1 + $0x38] sm:$0xff]  ;;  %v427_v1 = vld [vmem:[%s604_s1 + $0x30] sm:$0xff]  ;;  %v426_v2 = vld [vmem:[%s604_s1 + $0x28] sm:$0xff] }
   0x2   :  { %183 = vmatpush.bf16.msra.mxu0 %v428_v0  ;;  %484 = vmatpush.bf16.msra.mxu1 %v428_v0  ;;  %v425_v3 = vld [vmem:[%s604_s1 + $0x20] sm:$0xff]  ;;  %v424_v4 = vld [vmem:[%s604_s1 + $0x18] sm:$0xff]  ;;  %v423_v5 = vld [vmem:[%s604_s1 + $0x10] sm:$0xff] }
   0x3   :  { %485 = vmatpush.bf16.msra.mxu2 %v428_v0  ;;  %486 = vmatpush.bf16.msra.mxu3 %v428_v0  ;;  %v422_v6 = vld [vmem:[%s604_s1 + $0x8] sm:$0xff]  ;;  %v421_v7 = vld [vmem:[%s604_s1] sm:$0xff]  ;;  %v431_v9 = vld [vmem:[%s606_s0 + $0x10] sm:$0xff] }
   0x4   :  { %v429_v8 = vld [vmem:[%s606_s0] sm:$0xff]  ;;  %v435_v11 = vld [vmem:[%s606_s0 + $0x30] sm:$0xff]  ;;  %v430_v12 = vld [vmem:[%s606_s0 + $0x8] sm:$0xff] }
   0x5   :  { %v433_v10 = vld [vmem:[%s606_s0 + $0x20] sm:$0xff]  ;;  %v432_v13 = vld [vmem:[%s606_s0 + $0x18] sm:$0xff]  ;;  %v434_v14 = vld [vmem:[%s606_s0 + $0x28] sm:$0xff] }
   0x6   :  { %184 = vmatpush.bf16.msra.mxu0 %v427_v1  ;;  %487 = vmatpush.bf16.msra.mxu1 %v427_v1  ;;  %v436_v15 = vld [vmem:[%s606_s0 + $0x38] sm:$0xff]  ;;  %v508_v18 = vld [vmem:[%s605_s2] ss:$0 sm:$0xff] }
   0x7   :  { %488 = vmatpush.bf16.msra.mxu2 %v427_v1  ;;  %489 = vmatpush.bf16.msra.mxu3 %v427_v1 }
   0xa   :  { %185 = vmatpush.bf16.msra.mxu0 %v426_v2  ;;  %490 = vmatpush.bf16.msra.mxu1 %v426_v2 }
   0xb   :  { %491 = vmatpush.bf16.msra.mxu2 %v426_v2  ;;  %492 = vmatpush.bf16.msra.mxu3 %v426_v2 }
   0xe   :  { %186 = vmatpush.bf16.msra.mxu0 %v425_v3  ;;  %493 = vmatpush.bf16.msra.mxu1 %v425_v3 }
   0xf   :  { %494 = vmatpush.bf16.msra.mxu2 %v425_v3  ;;  %495 = vmatpush.bf16.msra.mxu3 %v425_v3 }
  0x12   :  { %187 = vmatpush.bf16.msra.mxu0 %v424_v4  ;;  %496 = vmatpush.bf16.msra.mxu1 %v424_v4 }
  0x13   :  { %497 = vmatpush.bf16.msra.mxu2 %v424_v4  ;;  %498 = vmatpush.bf16.msra.mxu3 %v424_v4 }
  0x16   :  { %188 = vmatpush.bf16.msra.mxu0 %v423_v5  ;;  %499 = vmatpush.bf16.msra.mxu1 %v423_v5 }
  0x17   :  { %500 = vmatpush.bf16.msra.mxu2 %v423_v5  ;;  %501 = vmatpush.bf16.msra.mxu3 %v423_v5 }
  0x1a   :  { %189 = vmatpush.bf16.msra.mxu0 %v422_v6  ;;  %502 = vmatpush.bf16.msra.mxu1 %v422_v6 }
  0x1b   :  { %503 = vmatpush.bf16.msra.mxu2 %v422_v6  ;;  %504 = vmatpush.bf16.msra.mxu3 %v422_v6 }
  0x1e   :  { %190 = vmatpush.bf16.msra.mxu0 %v421_v7  ;;  %505 = vmatpush.bf16.msra.mxu1 %v421_v7 }
  0x1f   :  { %506 = vmatpush.bf16.msra.mxu2 %v421_v7  ;;  %507 = vmatpush.bf16.msra.mxu3 %v421_v7 }
  0x21   :  { %191 = vmatmul.bf16.vlgmr.msra.gmra.mxu0 %v429_v8  ;;  %201 = vmatmul.bf16.vlgmr.msra.gmra.mxu1 %v431_v9 }
  0x22   :  { %211 = vmatmul.bf16.vlgmr.msra.gmra.mxu2 %v433_v10  ;;  %221 = vmatmul.bf16.vlgmr.msra.gmra.mxu3 %v435_v11 }
  0x31   :  { %196 = vmatmul.bf16.gmra.mxu0 %v430_v12  ;;  %206 = vmatmul.bf16.gmra.mxu1 %v432_v13 }
  0x32   :  { %216 = vmatmul.bf16.gmra.mxu2 %v434_v14  ;;  %226 = vmatmul.bf16.gmra.mxu3 %v436_v15 }
  0x9e   :  { %v192_v16 = vpop.f32.mrf.mxu0  ;;  %v202_v17 = vpop.f32.mrf.mxu1 }
  0x9f   :  { %v287_v19 = vadd.f32 %v508_v18, %v192_v16  ;;  %v291_v20 = vadd.f32 %v508_v18, %v202_v17 }
  0xa1   :  { %v303_v27 = vmax.f32 %v287_v19, 0.0  ;;  %v307_v28 = vmax.f32 %v291_v20, 0.0 }
  0xa5   :  { %v212_v21 = vpop.f32.mrf.mxu2  ;;  %v222_v22 = vpop.f32.mrf.mxu3 }
  0xa6   :  { %v194_v23 = vpop.f32.mrf.mxu0  ;;  %v204_v24 = vpop.f32.mrf.mxu1  ;;  %v295_v33 = vadd.f32 %v508_v18, %v212_v21  ;;  %v299_v34 = vadd.f32 %v508_v18, %v222_v22 }
  0xa7   :  { %v288_v25 = vadd.f32 %v508_v18, %v194_v23  ;;  %v292_v26 = vadd.f32 %v508_v18, %v204_v24 }
  0xa8   :  { %v311_v41 = vmax.f32 %v295_v33, 0.0  ;;  %v315_v42 = vmax.f32 %v299_v34, 0.0 }
  0xa9   :  { %v304_v29 = vmax.f32 %v288_v25, 0.0  ;;  %v308_v30 = vmax.f32 %v292_v26, 0.0 }
  0xab   :  { %v440_v31 = vpack.c.bf16 %v304_v29, %v303_v27  ;;  %v450_v32 = vpack.c.bf16 %v308_v30, %v307_v28 }
  0xad   :  { %441 = vst [vmem:[%s607_s3] sm:$0xff] %v440_v31   ;;  %v214_v35 = vpop.f32.mrf.mxu2  ;;  %v224_v36 = vpop.f32.mrf.mxu3 }
  0xae   :  { %478 = vst [vmem:[%s607_s3 + $0x10] sm:$0xff] %v450_v32   ;;  %v296_v37 = vadd.f32 %v508_v18, %v214_v35  ;;  %v300_v38 = vadd.f32 %v508_v18, %v224_v36  ;;  %v197_v39 = vpop.f32.mrf.mxu0  ;;  %v207_v40 = vpop.f32.mrf.mxu1 }
  0xaf   :  { %v289_v47 = vadd.f32 %v508_v18, %v197_v39  ;;  %v293_v48 = vadd.f32 %v508_v18, %v207_v40 }
  0xb0   :  { %v312_v43 = vmax.f32 %v296_v37, 0.0  ;;  %v316_v44 = vmax.f32 %v300_v38, 0.0 }
  0xb1   :  { %v305_v55 = vmax.f32 %v289_v47, 0.0  ;;  %v309_v56 = vmax.f32 %v293_v48, 0.0 }
  0xb2   :  { %v460_v45 = vpack.c.bf16 %v312_v43, %v311_v41  ;;  %v470_v46 = vpack.c.bf16 %v316_v44, %v315_v42 }
  0xb4   :  { %480 = vst [vmem:[%s607_s3 + $0x20] sm:$0xff] %v460_v45  }
  0xb5   :  { %482 = vst [vmem:[%s607_s3 + $0x30] sm:$0xff] %v470_v46   ;;  %v217_v49 = vpop.f32.mrf.mxu2  ;;  %v227_v50 = vpop.f32.mrf.mxu3 }
  0xb6   :  { %v199_v51 = vpop.f32.mrf.mxu0  ;;  %v209_v52 = vpop.f32.mrf.mxu1  ;;  %v297_v61 = vadd.f32 %v508_v18, %v217_v49  ;;  %v301_v62 = vadd.f32 %v508_v18, %v227_v50 }
  0xb7   :  { %v290_v53 = vadd.f32 %v508_v18, %v199_v51  ;;  %v294_v54 = vadd.f32 %v508_v18, %v209_v52 }
  0xb8   :  { %v313_v3 = vmax.f32 %v297_v61, 0.0  ;;  %v317_v4 = vmax.f32 %v301_v62, 0.0 }
  0xb9   :  { %v306_v57 = vmax.f32 %v290_v53, 0.0  ;;  %v310_v58 = vmax.f32 %v294_v54, 0.0 }
  0xbb   :  { %v445_v59 = vpack.c.bf16 %v306_v57, %v305_v55  ;;  %v455_v60 = vpack.c.bf16 %v310_v58, %v309_v56 }
  0xbd   :  { %477 = vst [vmem:[%s607_s3 + $0x8] sm:$0xff] %v445_v59   ;;  %v219_v63 = vpop.f32.mrf.mxu2  ;;  %v229_v0 = vpop.f32.mrf.mxu3 }
  0xbe   :  { %479 = vst [vmem:[%s607_s3 + $0x18] sm:$0xff] %v455_v60   ;;  %v298_v1 = vadd.f32 %v508_v18, %v219_v63  ;;  %v302_v2 = vadd.f32 %v508_v18, %v229_v0 }
  0xc0   :  { %v314_v5 = vmax.f32 %v298_v1, 0.0  ;;  %v318_v6 = vmax.f32 %v302_v2, 0.0 }
  0xc2   :  { %v465_v7 = vpack.c.bf16 %v314_v5, %v313_v3  ;;  %v475_v8 = vpack.c.bf16 %v318_v6, %v317_v4 }
  0xc4   :  { %481 = vst [vmem:[%s607_s3 + $0x28] sm:$0xff] %v465_v7  }
  0xc5   :  { %483 = vst [vmem:[%s607_s3 + $0x38] sm:$0xff] %v475_v8  }

// kernel: forward.5
= control target key start
LH: loop header
LB: loop body
LE: loop exit
PB: predicated region body
PF: predicated region fallthrough
CT: control target
= control target key end

     0   :  { %9 = vsyncpa [#allocation4], 0  ;;  %s875_s18 = smov [#allocation3]   ;;  %s876_s20 = smov 64   ;;  %s1218_s0 = inlined_call_operand.vmem [shape: bf16[128,128], index: 0, kind: input, shape index: {}]   ;;  %s1219_s1 = inlined_call_operand.vmem [shape: bf16[128,128], index: 1, kind: input, shape index: {}]   ;;  %s1220_s2 = inlined_call_operand.hbm [shape: bf16[128,128], index: 2, kind: input, shape index: {}]   ;;  %s1221_s3 = inlined_call_operand.vmem [shape: f32[1,128], index: 3, kind: input, shape index: {}]   ;;  %s1222_s4 = inlined_call_operand.vmem [shape: f32[128,128], index: 4, kind: output, shape index: {}]  }
   0x1   :  { %s18_s17 = sshll.u32 %s1220_s2, 4  ;;  %s20_s19 = sshll.u32 %s875_s18, 4  ;;  %s19_s17 = int_to_ptr.hbm [resolvable:$true] %s18_s17  ;;  %s21_s19 = int_to_ptr.vmem [resolvable:$true] %s20_s19 }
   0x2   :  { %s877_s21 = smov 4  }
   0x3   :  { %26 = dma.hbm_to_vmem [thread:$0]  %s19_s17, 1024, %s21_s19, [#allocation4], %s876_s20, %s876_s20, %s877_s21  }
   0x4   :  { %873 = dma.done.wait [#allocation4], 1024  }
   0x5   :  { %874 = vsyncadd [#allocation4], 4294966272  ;;  %v748_v0 = vld [vmem:[%s1219_s1 + $0x38] sm:$0xff]  ;;  %v747_v1 = vld [vmem:[%s1219_s1 + $0x30] sm:$0xff]  ;;  %v427_v48 = vlaneseq }
   0x6   :  { %202 = vmatpush.bf16.msra.mxu0 %v748_v0  ;;  %765 = vmatpush.bf16.msra.mxu2 %v748_v0  ;;  %v746_v2 = vld [vmem:[%s1219_s1 + $0x28] sm:$0xff]  ;;  %v745_v3 = vld [vmem:[%s1219_s1 + $0x20] sm:$0xff]  ;;  %v744_v4 = vld [vmem:[%s1219_s1 + $0x18] sm:$0xff] }
   0x7   :  { %v743_v5 = vld [vmem:[%s1219_s1 + $0x10] sm:$0xff]  ;;  %v742_v6 = vld [vmem:[%s1219_s1 + $0x8] sm:$0xff]  ;;  %v741_v7 = vld [vmem:[%s1219_s1] sm:$0xff]  ;;  %v954_v49 = vand.u32 127, %v427_v48 }
   0x8   :  { %v749_v8 = vld [vmem:[%s1218_s0] sm:$0xff]  ;;  %v750_v10 = vld [vmem:[%s1218_s0 + $0x8] sm:$0xff]  ;;  %v764_v12 = vld [vmem:[#allocation3 + $0x38] sm:$0xff] }
   0x9   :  { %v753_v9 = vld [vmem:[%s1218_s0 + $0x20] sm:$0xff]  ;;  %v754_v11 = vld [vmem:[%s1218_s0 + $0x28] sm:$0xff]  ;;  %378 = vmatpush.bf16.msra.mxu1 %v764_v12  ;;  %v763_v13 = vld [vmem:[#allocation3 + $0x30] sm:$0xff]  ;;  %773 = vmatpush.bf16.msra.mxu3 %v764_v12  ;;  %vm429_vm0 = vcmp.lt.s32.totalorder %v954_v49, 4 }
   0xa   :  { %203 = vmatpush.bf16.msra.mxu0 %v747_v1  ;;  %766 = vmatpush.bf16.msra.mxu2 %v747_v1  ;;  %v762_v14 = vld [vmem:[#allocation3 + $0x28] sm:$0xff]  ;;  %v761_v15 = vld [vmem:[#allocation3 + $0x20] sm:$0xff]  ;;  %v751_v16 = vld [vmem:[%s1218_s0 + $0x10] sm:$0xff] }
   0xb   :  { %v755_v17 = vld [vmem:[%s1218_s0 + $0x30] sm:$0xff]  ;;  %v760_v18 = vld [vmem:[#allocation3 + $0x18] sm:$0xff]  ;;  %v758_v22 = vld [vmem:[#allocation3 + $0x8] sm:$0xff] }
   0xc   :  { %v752_v19 = vld [vmem:[%s1218_s0 + $0x18] sm:$0xff]  ;;  %v759_v21 = vld [vmem:[#allocation3 + $0x10] sm:$0xff]  ;;  %v757_v23 = vld [vmem:[#allocation3] sm:$0xff] }
   0xd   :  { %379 = vmatpush.bf16.msra.mxu1 %v763_v13  ;;  %774 = vmatpush.bf16.msra.mxu3 %v763_v13  ;;  %v756_v20 = vld [vmem:[%s1218_s0 + $0x38] sm:$0xff]  ;;  %v959_v50 = vld [vmem:[%s1221_s3] ss:$0 sm:$0xff] }
   0xe   :  { %204 = vmatpush.bf16.msra.mxu0 %v746_v2  ;;  %767 = vmatpush.bf16.msra.mxu2 %v746_v2 }
  0x11   :  { %380 = vmatpush.bf16.msra.mxu1 %v762_v14  ;;  %775 = vmatpush.bf16.msra.mxu3 %v762_v14 }
  0x12   :  { %205 = vmatpush.bf16.msra.mxu0 %v745_v3  ;;  %768 = vmatpush.bf16.msra.mxu2 %v745_v3 }
  0x15   :  { %381 = vmatpush.bf16.msra.mxu1 %v761_v15  ;;  %776 = vmatpush.bf16.msra.mxu3 %v761_v15 }
  0x16   :  { %206 = vmatpush.bf16.msra.mxu0 %v744_v4  ;;  %769 = vmatpush.bf16.msra.mxu2 %v744_v4 }
  0x19   :  { %382 = vmatpush.bf16.msra.mxu1 %v760_v18  ;;  %777 = vmatpush.bf16.msra.mxu3 %v760_v18 }
  0x1a   :  { %207 = vmatpush.bf16.msra.mxu0 %v743_v5  ;;  %770 = vmatpush.bf16.msra.mxu2 %v743_v5 }
  0x1d   :  { %383 = vmatpush.bf16.msra.mxu1 %v759_v21  ;;  %778 = vmatpush.bf16.msra.mxu3 %v759_v21 }
  0x1e   :  { %208 = vmatpush.bf16.msra.mxu0 %v742_v6  ;;  %771 = vmatpush.bf16.msra.mxu2 %v742_v6 }
  0x21   :  { %384 = vmatpush.bf16.msra.mxu1 %v758_v22  ;;  %779 = vmatpush.bf16.msra.mxu3 %v758_v22 }
  0x22   :  { %209 = vmatpush.bf16.msra.mxu0 %v741_v7  ;;  %772 = vmatpush.bf16.msra.mxu2 %v741_v7 }
  0x25   :  { %210 = vmatmul.bf16.vlgmr.msra.gmra.mxu0 %v749_v8  ;;  %230 = vmatmul.bf16.vlgmr.msra.gmra.mxu2 %v753_v9 }
  0x26   :  { %385 = vmatpush.bf16.msra.mxu1 %v757_v23  ;;  %780 = vmatpush.bf16.msra.mxu3 %v757_v23 }
  0x35   :  { %215 = vmatmul.bf16.gmra.mxu0 %v750_v10  ;;  %235 = vmatmul.bf16.gmra.mxu2 %v754_v11 }
  0x45   :  { %220 = vmatmul.bf16.gmra.mxu0 %v751_v16  ;;  %240 = vmatmul.bf16.gmra.mxu2 %v755_v17 }
  0x55   :  { %225 = vmatmul.bf16.gmra.mxu0 %v752_v19  ;;  %245 = vmatmul.bf16.gmra.mxu2 %v756_v20 }
  0xa2   :  { %v211_v24 = vpop.f32.mrf.mxu0 }
  0xa8   :  { %v231_v25 = vpop.f32.mrf.mxu2 }
  0xaa   :  { %v213_v26 = vpop.f32.mrf.mxu0 }
  0xab   :  { %v302_v27 = vpack.c.bf16 %v213_v26, %v211_v24 }
  0xad   :  { %386 = vmatmul.bf16.vlgmr.msra.gmra.mxu1 %v302_v27 }
  0xb0   :  { %v233_v28 = vpop.f32.mrf.mxu2 }
  0xb1   :  { %v306_v29 = vpack.c.bf16 %v233_v28, %v231_v25 }
  0xb2   :  { %v216_v30 = vpop.f32.mrf.mxu0 }
  0xb3   :  { %406 = vmatmul.bf16.vlgmr.msra.gmra.mxu3 %v306_v29 }
  0xb8   :  { %v236_v31 = vpop.f32.mrf.mxu2 }
  0xba   :  { %v218_v32 = vpop.f32.mrf.mxu0 }
  0xbb   :  { %v303_v33 = vpack.c.bf16 %v218_v32, %v216_v30 }
  0xbd   :  { %391 = vmatmul.bf16.gmra.mxu1 %v303_v33 }
  0xc0   :  { %v238_v34 = vpop.f32.mrf.mxu2 }
  0xc1   :  { %v307_v35 = vpack.c.bf16 %v238_v34, %v236_v31 }
  0xc2   :  { %v221_v36 = vpop.f32.mrf.mxu0 }
  0xc3   :  { %411 = vmatmul.bf16.gmra.mxu3 %v307_v35 }
  0xc8   :  { %v241_v37 = vpop.f32.mrf.mxu2 }
  0xca   :  { %v223_v38 = vpop.f32.mrf.mxu0 }
  0xcb   :  { %v304_v39 = vpack.c.bf16 %v223_v38, %v221_v36 }
  0xcd   :  { %396 = vmatmul.bf16.gmra.mxu1 %v304_v39 }
  0xd0   :  { %v243_v40 = vpop.f32.mrf.mxu2 }
  0xd1   :  { %v308_v41 = vpack.c.bf16 %v243_v40, %v241_v37 }
  0xd2   :  { %v226_v42 = vpop.f32.mrf.mxu0 }
  0xd3   :  { %416 = vmatmul.bf16.gmra.mxu3 %v308_v41 }
  0xd8   :  { %v246_v43 = vpop.f32.mrf.mxu2 }
  0xda   :  { %v228_v44 = vpop.f32.mrf.mxu0 }
  0xdb   :  { %v305_v45 = vpack.c.bf16 %v228_v44, %v226_v42 }
  0xdd   :  { %401 = vmatmul.bf16.gmra.mxu1 %v305_v45 }
  0xe0   :  { %v248_v46 = vpop.f32.mrf.mxu2 }
  0xe1   :  { %v309_v47 = vpack.c.bf16 %v248_v46, %v246_v43 }
  0xe3   :  { %421 = vmatmul.bf16.gmra.mxu3 %v309_v47 }
 0x12a   :  { %v387_v51 = vpop.f32.mrf.mxu1 }
 0x12b   :  { %v388_v52 = vadd.f32 %v959_v50, %v387_v51 }
 0x12d   :  { %v965_v53 = vsel %vm429_vm0, %v388_v52, -inf }
 0x12e   :  { %446 = vmax.xlane.f32.xlu0 %v965_v53 }
 0x132   :  { %v389_v54 = vpop.f32.mrf.mxu1 }
 0x133   :  { %v390_v55 = vadd.f32 %v959_v50, %v389_v54 }
 0x135   :  { %v971_v56 = vsel %vm429_vm0, %v390_v55, -inf }
 0x136   :  { %v407_v57 = vpop.f32.mrf.mxu3  ;;  %448 = vmax.xlane.f32.xlu0 %v971_v56 }
 0x137   :  { %v408_v58 = vadd.f32 %v959_v50, %v407_v57 }
 0x139   :  { %v977_v59 = vsel %vm429_vm0, %v408_v58, -inf }
 0x13a   :  { %462 = vmax.xlane.f32.xlu2 %v977_v59  ;;  %v392_v60 = vpop.f32.mrf.mxu1 }
 0x13b   :  { %v393_v61 = vadd.f32 %v959_v50, %v392_v60 }
 0x13d   :  { %v983_v62 = vsel %vm429_vm0, %v393_v61, -inf }
 0x13e   :  { %v409_v63 = vpop.f32.mrf.mxu3  ;;  %450 = vmax.xlane.f32.xlu1 %v983_v62 }
 0x13f   :  { %v410_v0 = vadd.f32 %v959_v50, %v409_v63 }
 0x141   :  { %v989_v1 = vsel %vm429_vm0, %v410_v0, -inf }
 0x142   :  { %464 = vmax.xlane.f32.xlu0 %v989_v1  ;;  %v394_v2 = vpop.f32.mrf.mxu1 }
 0x143   :  { %v395_v3 = vadd.f32 %v959_v50, %v394_v2 }
 0x145   :  { %v995_v4 = vsel %vm429_vm0, %v395_v3, -inf }
 0x146   :  { %v412_v5 = vpop.f32.mrf.mxu3  ;;  %452 = vmax.xlane.f32.xlu1 %v995_v4 }
 0x147   :  { %v413_v6 = vadd.f32 %v959_v50, %v412_v5 }
 0x149   :  { %v1002_v9 = vsel %vm429_vm0, %v413_v6, -inf }
 0x14a   :  { %v397_v7 = vpop.f32.mrf.mxu1 }
 0x14b   :  { %v398_v8 = vadd.f32 %v959_v50, %v397_v7 }
 0x14d   :  { %v1006_v10 = vsel %vm429_vm0, %v398_v8, -inf }
 0x14e   :  { %v414_v11 = vpop.f32.mrf.mxu3  ;;  %466 = vmax.xlane.f32.xlu1 %v1002_v9  ;;  %454 = vmax.xlane.f32.xlu2 %v1006_v10 }
 0x14f   :  { %v415_v12 = vadd.f32 %v959_v50, %v414_v11 }
 0x151   :  { %v1013_v14 = vsel %vm429_vm0, %v415_v12, -inf }
 0x152   :  { %v399_v13 = vpop.f32.mrf.mxu1 }
 0x153   :  { %v400_v17 = vadd.f32 %v959_v50, %v399_v13 }
 0x155   :  { %v1026_v21 = vsel %vm429_vm0, %v400_v17, -inf }
 0x156   :  { %v417_v15 = vpop.f32.mrf.mxu3  ;;  %468 = vmax.xlane.f32.xlu2 %v1013_v14 }
 0x157   :  { %v418_v16 = vadd.f32 %v959_v50, %v417_v15 }
 0x159   :  { %v1020_v18 = vsel %vm429_vm0, %v418_v16, -inf }
 0x15a   :  { %470 = vmax.xlane.f32.xlu0 %v1020_v18  ;;  %v402_v19 = vpop.f32.mrf.mxu1 }
 0x15b   :  { %v403_v20 = vadd.f32 %v959_v50, %v402_v19 }
 0x15d   :  { %v1031_v23 = vsel %vm429_vm0, %v403_v20, -inf }
 0x15e   :  { %v419_v22 = vpop.f32.mrf.mxu3  ;;  %456 = vmax.xlane.f32.xlu2 %v1026_v21 }
 0x15f   :  { %v420_v29 = vadd.f32 %v959_v50, %v419_v22 }
 0x161   :  { %v1049_v31 = vsel %vm429_vm0, %v420_v29, -inf }
 0x162   :  { %v404_v24 = vpop.f32.mrf.mxu1  ;;  %458 = vmax.xlane.f32.xlu0 %v1031_v23 }
 0x163   :  { %v405_v25 = vadd.f32 %v959_v50, %v404_v24 }
 0x165   :  { %v1037_v26 = vsel %vm429_vm0, %v405_v25, -inf }
 0x166   :  { %v422_v27 = vpop.f32.mrf.mxu3  ;;  %460 = vmax.xlane.f32.xlu1 %v1037_v26 }
 0x167   :  { %v423_v28 = vadd.f32 %v959_v50, %v422_v27 }
 0x169   :  { %v1044_v30 = vsel %vm429_vm0, %v423_v28, -inf }
 0x16a   :  { %474 = vmax.xlane.f32.xlu2 %v1044_v30 }
 0x16e   :  { %v424_v32 = vpop.f32.mrf.mxu3  ;;  %472 = vmax.xlane.f32.xlu1 %v1049_v31 }
 0x16f   :  { %v425_v33 = vadd.f32 %v959_v50, %v424_v32 }
 0x171   :  { %v1055_v34 = vsel %vm429_vm0, %v425_v33, -inf }
 0x172   :  { %476 = vmax.xlane.f32.xlu0 %v1055_v34 }
 0x1a1   :  { %v447_v35 = vpop.xlane.xlu0 %446 }
 0x1a2   :  { %v1059_v36 = vsub.f32 %v965_v53, %v447_v35 }
 0x1a4   :  { %v494_v37 = vmul.f32 1.442695, %v1059_v36 }
 0x1a6   :  { %785 = vpow2.f32 %v494_v37 }
 0x1a9   :  { %v449_v38 = vpop.xlane.xlu0 %448 }
 0x1aa   :  { %v1063_v39 = vsub.f32 %v971_v56, %v449_v38 }
 0x1ac   :  { %v786_v40 = vpop.eup %785  ;;  %v496_v41 = vmul.f32 1.442695, %v1063_v39 }
 0x1ad   :  { %v463_v42 = vpop.xlane.xlu2 %462  ;;  %526 = vadd.xlane.f32.xlu1 %v786_v40 }
 0x1ae   :  { %787 = vpow2.f32 %v496_v41  ;;  %v1067_v43 = vsub.f32 %v977_v59, %v463_v42 }
 0x1b0   :  { %v510_v44 = vmul.f32 1.442695, %v1067_v43 }
 0x1b1   :  { %v451_v45 = vpop.xlane.xlu1 %450 }
 0x1b2   :  { %789 = vpow2.f32 %v510_v44  ;;  %v1071_v46 = vsub.f32 %v983_v62, %v451_v45 }
 0x1b4   :  { %v788_v47 = vpop.eup %787  ;;  %v498_v48 = vmul.f32 1.442695, %v1071_v46 }
 0x1b5   :  { %v465_v50 = vpop.xlane.xlu0 %464  ;;  %528 = vadd.xlane.f32.xlu2 %v788_v47 }
 0x1b6   :  { %v1075_v51 = vsub.f32 %v989_v1, %v465_v50  ;;  %791 = vpow2.f32 %v498_v48 }
 0x1b8   :  { %v790_v52 = vpop.eup %789  ;;  %v512_v53 = vmul.f32 1.442695, %v1075_v51 }
 0x1b9   :  { %v453_v54 = vpop.xlane.xlu1 %452  ;;  %542 = vadd.xlane.f32.xlu0 %v790_v52 }
 0x1ba   :  { %793 = vpow2.f32 %v512_v53  ;;  %v1079_v55 = vsub.f32 %v995_v4, %v453_v54 }
 0x1bc   :  { %v500_v56 = vmul.f32 1.442695, %v1079_v55  ;;  %v792_v57 = vpop.eup %791 }
 0x1be   :  { %795 = vpow2.f32 %v500_v56 }
 0x1c0   :  { %v794_v58 = vpop.eup %793 }
 0x1c1   :  { %v467_v59 = vpop.xlane.xlu1 %466  ;;  %v455_v60 = vpop.xlane.xlu2 %454  ;;  %544 = vadd.xlane.f32.xlu1 %v794_v58  ;;  %530 = vadd.xlane.f32.xlu0 %v792_v57 }
 0x1c2   :  { %v1083_v61 = vsub.f32 %v1002_v9, %v467_v59  ;;  %v1087_v63 = vsub.f32 %v1006_v10, %v455_v60 }
 0x1c4   :  { %v514_v62 = vmul.f32 1.442695, %v1083_v61  ;;  %v796_v0 = vpop.eup %795  ;;  %v502_v1 = vmul.f32 1.442695, %v1087_v63 }
 0x1c6   :  { %797 = vpow2.f32 %v514_v62 }
 0x1c7   :  { %799 = vpow2.f32 %v502_v1 }
 0x1c9   :  { %v469_v2 = vpop.xlane.xlu2 %468  ;;  %532 = vadd.xlane.f32.xlu1 %v796_v0 }
 0x1ca   :  { %v1091_v3 = vsub.f32 %v1013_v14, %v469_v2 }
 0x1cc   :  { %v798_v4 = vpop.eup %797  ;;  %v516_v5 = vmul.f32 1.442695, %v1091_v3 }
 0x1cd   :  { %v471_v6 = vpop.xlane.xlu0 %470  ;;  %546 = vadd.xlane.f32.xlu2 %v798_v4  ;;  %v800_v11 = vpop.eup %799 }
 0x1ce   :  { %801 = vpow2.f32 %v516_v5  ;;  %v1095_v7 = vsub.f32 %v1020_v18, %v471_v6 }
 0x1d0   :  { %v518_v8 = vmul.f32 1.442695, %v1095_v7 }
 0x1d1   :  { %v457_v9 = vpop.xlane.xlu2 %456 }
 0x1d2   :  { %803 = vpow2.f32 %v518_v8  ;;  %v1099_v10 = vsub.f32 %v1026_v21, %v457_v9 }
 0x1d4   :  { %v802_v12 = vpop.eup %801  ;;  %v504_v13 = vmul.f32 1.442695, %v1099_v10 }
 0x1d5   :  { %534 = vadd.xlane.f32.xlu2 %v800_v11  ;;  %548 = vadd.xlane.f32.xlu0 %v802_v12  ;;  %v459_v14 = vpop.xlane.xlu0 %458 }
 0x1d6   :  { %805 = vpow2.f32 %v504_v13  ;;  %v1103_v15 = vsub.f32 %v1031_v23, %v459_v14 }
 0x1d8   :  { %v804_v16 = vpop.eup %803  ;;  %v506_v17 = vmul.f32 1.442695, %v1103_v15 }
 0x1d9   :  { %550 = vadd.xlane.f32.xlu1 %v804_v16  ;;  %v461_v18 = vpop.xlane.xlu1 %460 }
 0x1da   :  { %807 = vpow2.f32 %v506_v17  ;;  %v1107_v19 = vsub.f32 %v1037_v26, %v461_v18 }
 0x1dc   :  { %v806_v20 = vpop.eup %805  ;;  %v508_v21 = vmul.f32 1.442695, %v1107_v19 }
 0x1dd   :  { %v475_v22 = vpop.xlane.xlu2 %474  ;;  %536 = vadd.xlane.f32.xlu0 %v806_v20 }
 0x1de   :  { %809 = vpow2.f32 %v508_v21  ;;  %v1111_v24 = vsub.f32 %v1044_v30, %v475_v22 }
 0x1e0   :  { %v808_v23 = vpop.eup %807  ;;  %v522_v25 = vmul.f32 1.442695, %v1111_v24 }
 0x1e1   :  { %v473_v27 = vpop.xlane.xlu1 %472  ;;  %538 = vadd.xlane.f32.xlu1 %v808_v23 }
 0x1e2   :  { %811 = vpow2.f32 %v522_v25  ;;  %v1115_v28 = vsub.f32 %v1049_v31, %v473_v27 }
 0x1e4   :  { %v810_v26 = vpop.eup %809  ;;  %v520_v29 = vmul.f32 1.442695, %v1115_v28 }
 0x1e5   :  { %540 = vadd.xlane.f32.xlu2 %v810_v26  ;;  %v477_v32 = vpop.xlane.xlu0 %476 }
 0x1e6   :  { %813 = vpow2.f32 %v520_v29  ;;  %v1119_v33 = vsub.f32 %v1055_v34, %v477_v32 }
 0x1e8   :  { %v812_v30 = vpop.eup %811  ;;  %v524_v35 = vmul.f32 1.442695, %v1119_v33 }
 0x1e9   :  { %554 = vadd.xlane.f32.xlu0 %v812_v30 }
 0x1ea   :  { %815 = vpow2.f32 %v524_v35 }
 0x1ec   :  { %v814_v37 = vpop.eup %813 }
 0x1ed   :  { %552 = vadd.xlane.f32.xlu2 %v814_v37 }
 0x1f0   :  { %v816_v38 = vpop.eup %815 }
 0x1f1   :  { %556 = vadd.xlane.f32.xlu1 %v816_v38 }
 0x220   :  { %v527_v31 = vpop.xlane.xlu1 %526 }
 0x221   :  { %817 = vlog2.f32 %v527_v31 }
 0x227   :  { %v818_v40 = vpop.eup %817 }
 0x228   :  { %v559_v41 = vmul.f32 0.6931472, %v818_v40  ;;  %v529_v42 = vpop.xlane.xlu2 %528 }
 0x229   :  { %819 = vlog2.f32 %v529_v42 }
 0x22a   :  { %v590_v44 = vsub.f32 %v1059_v36, %v559_v41 }
 0x22c   :  { %v606_v34 = vsel %vm429_vm0, %v590_v44, 0.0  ;;  %v543_v45 = vpop.xlane.xlu0 %542 }
 0x22d   :  { %622 = vst [vmem:[%s1222_s4] sm:$0xff] %v606_v34  ;;  %821 = vlog2.f32 %v543_v45 }
 0x22f   :  { %v820_v47 = vpop.eup %819 }
 0x230   :  { %v561_v48 = vmul.f32 0.6931472, %v820_v47 }
 0x232   :  { %v591_v50 = vsub.f32 %v1063_v39, %v561_v48 }
 0x233   :  { %v822_v52 = vpop.eup %821 }
 0x234   :  { %v607_v53 = vsel %vm429_vm0, %v591_v50, 0.0  ;;  %v575_v54 = vmul.f32 0.6931472, %v822_v52  ;;  %v545_v56 = vpop.xlane.xlu1 %544  ;;  %v531_v36 = vpop.xlane.xlu0 %530 }
 0x235   :  { %623 = vst [vmem:[%s1222_s4 + $0x8] sm:$0xff] %v607_v53  ;;  %823 = vlog2.f32 %v545_v56 }
 0x236   :  { %v598_v57 = vsub.f32 %v1067_v43, %v575_v54  ;;  %825 = vlog2.f32 %v531_v36 }
 0x238   :  { %v614_v58 = vsel %vm429_vm0, %v598_v57, 0.0 }
 0x239   :  { %630 = vst [vmem:[%s1222_s4 + $0x40] sm:$0xff] %v614_v58 }
 0x23b   :  { %v824_v39 = vpop.eup %823 }
 0x23c   :  { %v826_v59 = vpop.eup %825  ;;  %v577_v60 = vmul.f32 0.6931472, %v824_v39  ;;  %v533_v62 = vpop.xlane.xlu1 %532 }
 0x23d   :  { %v563_v0 = vmul.f32 0.6931472, %v826_v59  ;;  %827 = vlog2.f32 %v533_v62 }
 0x23e   :  { %v599_v1 = vsub.f32 %v1075_v51, %v577_v60 }
 0x23f   :  { %v592_v2 = vsub.f32 %v1071_v46, %v563_v0 }
 0x240   :  { %v615_v43 = vsel %vm429_vm0, %v599_v1, 0.0  ;;  %v547_v4 = vpop.xlane.xlu2 %546 }
 0x241   :  { %631 = vst [vmem:[%s1222_s4 + $0x48] sm:$0xff] %v615_v43  ;;  %v608_v5 = vsel %vm429_vm0, %v592_v2, 0.0  ;;  %829 = vlog2.f32 %v547_v4 }
 0x242   :  { %624 = vst [vmem:[%s1222_s4 + $0x10] sm:$0xff] %v608_v5 }
 0x243   :  { %v828_v6 = vpop.eup %827 }
 0x244   :  { %v565_v51 = vmul.f32 0.6931472, %v828_v6 }
 0x246   :  { %v593_v46 = vsub.f32 %v1079_v55, %v565_v51 }
 0x247   :  { %v830_v8 = vpop.eup %829 }
 0x248   :  { %v609_v9 = vsel %vm429_vm0, %v593_v46, 0.0  ;;  %v579_v11 = vmul.f32 0.6931472, %v830_v8  ;;  %v535_v12 = vpop.xlane.xlu2 %534  ;;  %v549_v13 = vpop.xlane.xlu0 %548 }
 0x249   :  { %625 = vst [vmem:[%s1222_s4 + $0x18] sm:$0xff] %v609_v9  ;;  %831 = vlog2.f32 %v535_v12 }
 0x24a   :  { %v600_v14 = vsub.f32 %v1083_v61, %v579_v11  ;;  %833 = vlog2.f32 %v549_v13 }
 0x24c   :  { %v616_v16 = vsel %vm429_vm0, %v600_v14, 0.0  ;;  %v551_v17 = vpop.xlane.xlu1 %550 }
 0x24d   :  { %632 = vst [vmem:[%s1222_s4 + $0x50] sm:$0xff] %v616_v16  ;;  %835 = vlog2.f32 %v551_v17 }
 0x24f   :  { %v832_v55 = vpop.eup %831 }
 0x250   :  { %v834_v18 = vpop.eup %833  ;;  %v567_v20 = vmul.f32 0.6931472, %v832_v55  ;;  %v537_v21 = vpop.xlane.xlu0 %536 }
 0x251   :  { %v581_v22 = vmul.f32 0.6931472, %v834_v18  ;;  %837 = vlog2.f32 %v537_v21 }
 0x252   :  { %v594_v23 = vsub.f32 %v1087_v63, %v567_v20 }
 0x253   :  { %v836_v25 = vpop.eup %835  ;;  %v601_v61 = vsub.f32 %v1091_v3, %v581_v22 }
 0x254   :  { %v610_v27 = vsel %vm429_vm0, %v594_v23, 0.0  ;;  %v583_v26 = vmul.f32 0.6931472, %v836_v25  ;;  %v539_v29 = vpop.xlane.xlu1 %538 }
 0x255   :  { %626 = vst [vmem:[%s1222_s4 + $0x20] sm:$0xff] %v610_v27  ;;  %v617_v32 = vsel %vm429_vm0, %v601_v61, 0.0  ;;  %839 = vlog2.f32 %v539_v29 }
 0x256   :  { %633 = vst [vmem:[%s1222_s4 + $0x58] sm:$0xff] %v617_v32  ;;  %v602_v63 = vsub.f32 %v1095_v7, %v583_v26 }
 0x257   :  { %v838_v3 = vpop.eup %837 }
 0x258   :  { %v618_v30 = vsel %vm429_vm0, %v602_v63, 0.0  ;;  %v569_v35 = vmul.f32 0.6931472, %v838_v3  ;;  %v541_v37 = vpop.xlane.xlu2 %540 }
 0x259   :  { %634 = vst [vmem:[%s1222_s4 + $0x60] sm:$0xff] %v618_v30  ;;  %841 = vlog2.f32 %v541_v37 }
 0x25a   :  { %v595_v38 = vsub.f32 %v1099_v10, %v569_v35 }
 0x25b   :  { %v840_v31 = vpop.eup %839 }
 0x25c   :  { %v611_v40 = vsel %vm429_vm0, %v595_v38, 0.0  ;;  %v571_v41 = vmul.f32 0.6931472, %v840_v31  ;;  %v555_v42 = vpop.xlane.xlu0 %554 }
 0x25d   :  { %627 = vst [vmem:[%s1222_s4 + $0x28] sm:$0xff] %v611_v40  ;;  %843 = vlog2.f32 %v555_v42 }
 0x25e   :  { %v596_v7 = vsub.f32 %v1103_v15, %v571_v41 }
 0x25f   :  { %v842_v44 = vpop.eup %841 }
 0x260   :  { %v612_v34 = vsel %vm429_vm0, %v596_v7, 0.0  ;;  %v573_v45 = vmul.f32 0.6931472, %v842_v44  ;;  %v553_v47 = vpop.xlane.xlu2 %552 }
 0x261   :  { %628 = vst [vmem:[%s1222_s4 + $0x30] sm:$0xff] %v612_v34  ;;  %845 = vlog2.f32 %v553_v47 }
 0x262   :  { %v597_v10 = vsub.f32 %v1107_v19, %v573_v45 }
 0x263   :  { %v844_v48 = vpop.eup %843 }
 0x264   :  { %v613_v50 = vsel %vm429_vm0, %v597_v10, 0.0  ;;  %v587_v52 = vmul.f32 0.6931472, %v844_v48  ;;  %v557_v53 = vpop.xlane.xlu1 %556 }
 0x265   :  { %629 = vst [vmem:[%s1222_s4 + $0x38] sm:$0xff] %v613_v50  ;;  %847 = vlog2.f32 %v557_v53 }
 0x266   :  { %v604_v15 = vsub.f32 %v1111_v24, %v587_v52 }
 0x267   :  { %v846_v54 = vpop.eup %845 }
 0x268   :  { %v620_v56 = vsel %vm429_vm0, %v604_v15, 0.0  ;;  %v585_v36 = vmul.f32 0.6931472, %v846_v54 }
 0x269   :  { %636 = vst [vmem:[%s1222_s4 + $0x70] sm:$0xff] %v620_v56 }
 0x26a   :  { %v603_v19 = vsub.f32 %v1115_v28, %v585_v36 }
 0x26b   :  { %v848_v57 = vpop.eup %847 }
 0x26c   :  { %v619_v58 = vsel %vm429_vm0, %v603_v19, 0.0  ;;  %v589_v39 = vmul.f32 0.6931472, %v848_v57 }
 0x26d   :  { %635 = vst [vmem:[%s1222_s4 + $0x68] sm:$0xff] %v619_v58 }
 0x26e   :  { %v605_v24 = vsub.f32 %v1119_v33, %v589_v39 }
 0x270   :  { %v621_v59 = vsel %vm429_vm0, %v605_v24, 0.0 }
 0x271   :  { %637 = vst [vmem:[%s1222_s4 + $0x78] sm:$0xff] %v621_v59 }
 0x272   :  { %642 = vsyncpa [#allocation4], 1 }

</bundles_post_ra>
